<compile_context>
chip_gen: v5e
topology: v5e:2x2
jax: 0.10.0
libtpu: 0.0.40
codegen_flags: <defaults>
</compile_context>

<pallas_src>
import functools
import math

import jax
import jax.numpy as jnp
from jax.experimental import pallas as pl
from jax.experimental.pallas import tpu as pltpu

INTEGRAL = 2.0        # args.integral
HIDDEN = 32           # stand-in for args.netsize
MAX_TILE_T = 16384    # max pixels per grid step (lane axis)

_C1 = 0.7978845608028654          # sqrt(2/pi)
_C1C2 = _C1 * 0.044715            # folded GELU polynomial constant


def _round_up(x, m):
    return ((x + m - 1) // m) * m


def _func_wrapper_kernel(scal_ref, z_ref, w1t_ref, b1f_ref, w2t_ref, b2_ref,
                         f_ref, *, compute_dtype):
    # scal_ref: SMEM f32[2] = [coef, coef*inv]
    coef = scal_ref[0]
    scale = scal_ref[1]

    z = z_ref[0]                                                   # (C, T) f32, lane-dense

    # stand-in func(z, col_vec): pointwise MLP, time embedding folded into b1f.
    h = jnp.dot(w1t_ref[...], z, preferred_element_type=jnp.float32)   # (Hd, T)
    h = (h + b1f_ref[...]).astype(compute_dtype)                   # bias + temb

    # cheap tanh-approx GELU: 0.5h + 0.5h*tanh(h*(c1 + c1*c2*h*h))
    hh = 0.5 * h
    arg = h * (_C1 + _C1C2 * (h * h))
    g = hh + hh * jnp.tanh(arg)                                    # tanh -> EUP slot

    dz = jnp.dot(w2t_ref[...], g, preferred_element_type=jnp.float32)  # (C, T)
    dz = dz + b2_ref[...]

    # f = coef*z - (coef*inv)*dz_dt   (scales applied here, not folded into W2)
    f_ref[0] = (coef * z - scale * dz).astype(f_ref.dtype)


def _choose_tile(hw, batch, max_tile=MAX_TILE_T):
    """Pixel tile: multiple of 128, <= max_tile; >=2 total grid blocks if possible."""
    tile = min(max_tile, _round_up(hw, 128))
    if batch == 1:
        # ensure >= 2 pixel tiles so both v7x TensorCores get work
        while tile >= 256 and pl.cdiv(hw, tile) < 2:
            tile = _round_up(tile // 2, 128)
    return tile


def _hidden_compute_dtype():
    """bf16 hidden path on v6e/v7x (bf16 VPU/EUP); f32 on v5e and older."""
    try:
        kind = jax.devices()[0].device_kind.lower()
    except Exception:  # pragma: no cover
        kind = ""
    if any(tag in kind for tag in ("v2", "v3", "v4", "v5")):
        return jnp.float32
    return jnp.bfloat16


def func_wrapper_forward(t, z_nchw, params):
    """Func_Wrapper.forward in 'generate' mode.

    t: scalar; z_nchw: [B, C, H, W] float32.  Returns f with the same shape.
    """
    w1, b1, wt, bt, w2, b2 = params
    B, C, H, W = z_nchw.shape
    Hd = w1.shape[1]
    HW = H * W

    compute_dtype = _hidden_compute_dtype()

    # Free reshape, no transpose: pixels go on the lane axis.
    z3 = z_nchw.reshape(B, C, HW)

    tile_t = _choose_tile(HW, B)
    hw_pad = pl.cdiv(HW, tile_t) * tile_t
    if hw_pad != HW:
        z3 = jnp.pad(z3, ((0, 0), (0, 0), (0, hw_pad - HW)))

    a = INTEGRAL
    t = jnp.float32(t)

    # Host-side scalar folding (all tiny, no pass over z):
    col = a * t * t                                   # col_vec entries (all equal)
    temb = col * wt + bt                              # (Hd,) time embedding
    coef = -a * t                                     # -0.5 * (2*a*t)
    inv = 1.0 / jnp.sqrt(-jnp.expm1(-(a * t * t)))    # expm1: no cancellation at small t

    w1t = jnp.transpose(w1).astype(jnp.float32)                   # (Hd, C)
    b1f = (b1 + temb).reshape(Hd, 1).astype(jnp.float32)          # bias + temb
    w2t = jnp.transpose(w2).astype(compute_dtype)                 # (C, Hd)
    b2c = b2.reshape(C, 1).astype(jnp.float32)
    scal = jnp.stack([coef, coef * inv]).astype(jnp.float32)      # SMEM scalars

    grid = (B, hw_pad // tile_t)
    kernel = functools.partial(_func_wrapper_kernel, compute_dtype=compute_dtype)

    f3 = pl.pallas_call(
        kernel,
        out_shape=jax.ShapeDtypeStruct((B, C, hw_pad), jnp.float32),
        grid=grid,
        in_specs=[
            pl.BlockSpec(memory_space=pltpu.SMEM),                       # [coef, coef*inv]
            pl.BlockSpec((1, C, tile_t), lambda b, i: (b, 0, i)),        # z
            pl.BlockSpec((Hd, C), lambda b, i: (0, 0)),                  # w1t
            pl.BlockSpec((Hd, 1), lambda b, i: (0, 0)),                  # b1f (+temb)
            pl.BlockSpec((C, Hd), lambda b, i: (0, 0)),                  # w2t
            pl.BlockSpec((C, 1), lambda b, i: (0, 0)),                   # b2
        ],
        out_specs=pl.BlockSpec((1, C, tile_t), lambda b, i: (b, 0, i)),
        compiler_params=pltpu.CompilerParams(
            dimension_semantics=("parallel", "parallel"),
            vmem_limit_bytes=48 * 1024 * 1024),
    )(scal, z3, w1t, b1f, w2t, b2c)

    return f3[:, :, :HW].reshape(B, C, H, W)


def _reference(t, z_nchw, params):
    """Pure-JAX reference of the fused stand-in forward."""
    w1, b1, wt, bt, w2, b2 = params
    a = INTEGRAL
    t = jnp.float32(t)
    B, C, H, W = z_nchw.shape
    zf = jnp.transpose(z_nchw, (0, 2, 3, 1)).reshape(-1, C)
    temb = a * t * t * wt + bt
    h = zf @ w1 + b1 + temb
    h = 0.5 * h * (1.0 + jnp.tanh(_C1 * (h + 0.044715 * h * h * h)))
    dz = h @ w2 + b2
    coef = -a * t
    inv = 1.0 / jnp.sqrt(-jnp.expm1(-(a * t * t)))
    f = coef * (zf - inv * dz)
    return jnp.transpose(f.reshape(B, H, W, C), (0, 3, 1, 2))


def init_params(key, channels=3, hidden=HIDDEN):
    k1, k2, k3, k4 = jax.random.split(key, 4)
    w1 = jax.random.normal(k1, (channels, hidden), jnp.float32) * (1.0 / math.sqrt(channels))
    b1 = jnp.zeros((hidden,), jnp.float32)
    wt = jax.random.normal(k2, (hidden,), jnp.float32) * 0.1   # time embedding
    bt = jnp.zeros((hidden,), jnp.float32)
    w2 = jax.random.normal(k3, (hidden, channels), jnp.float32) * (1.0 / math.sqrt(hidden))
    b2 = jax.random.normal(k4, (channels,), jnp.float32) * 0.01
    return (w1, b1, wt, bt, w2, b2)


if __name__ == "__main__":
    key = jax.random.PRNGKey(0)
    kz, kp, kz2 = jax.random.split(key, 3)

    params = init_params(kp, channels=3, hidden=HIDDEN)
    t = 0.5

    # Main case: B=2, C=3, 16x16 (HW=256 -> one lane-dense tile per batch).
    B, C, H, W = 2, 3, 16, 16
    z = jax.random.normal(kz, (B, C, H, W), jnp.float32)      # NCHW like PyTorch
    f = func_wrapper_forward(t, z, params)
    jax.block_until_ready(f)
    assert f.shape == (B, C, H, W) and f.dtype == jnp.float32
    f_ref = _reference(t, z, params)
    assert bool(jnp.all(jnp.isfinite(f)))
    # lenient tolerance: bf16 hidden path on v6e/v7x, bf16 MXU passes
    assert bool(jnp.allclose(f, f_ref, rtol=3e-2, atol=3e-2))

    # Padded + single-batch case: HW=400 is not a 128 multiple; B=1 forces the
    # pixel-axis split (>=2 grid blocks) and exercises the padding path.
    B2, H2, W2 = 1, 20, 20
    z2 = jax.random.normal(kz2, (B2, C, H2, W2), jnp.float32)
    f2 = func_wrapper_forward(t, z2, params)
    jax.block_until_ready(f2)
    assert f2.shape == (B2, C, H2, W2)
    f2_ref = _reference(t, z2, params)
    assert bool(jnp.all(jnp.isfinite(f2)))
    assert bool(jnp.allclose(f2, f2_ref, rtol=3e-2, atol=3e-2))

    print("KERNEL_OK")
</pallas_src>

<mosaic_0001>
module attributes {stable_mosaic.version = 11 : i64} {
  func.func @_func_wrapper_kernel(%arg0: i32, %arg1: i32, %arg2: memref<2xf32, #tpu.memory_space<smem>>, %arg3: memref<1x3x256xf32, #tpu.memory_space<vmem>>, %arg4: memref<32x3xf32, #tpu.memory_space<vmem>>, %arg5: memref<32x1xf32, #tpu.memory_space<vmem>>, %arg6: memref<3x32xbf16, #tpu.memory_space<vmem>>, %arg7: memref<3x1xf32, #tpu.memory_space<vmem>>, %arg8: memref<1x3x256xf32, #tpu.memory_space<vmem>>) attributes {dimension_semantics = [#tpu.dimension_semantics<parallel>, #tpu.dimension_semantics<parallel>], iteration_bounds = array<i64: 2, 1>, scalar_prefetch = 0 : i64, scratch_operands = 0 : i64, tpu.core_type = #tpu.core_type<tc>, window_params = [{transform_indices = @transform_0, window_bounds = array<i64: 2>}, {transform_indices = @transform_1, window_bounds = array<i64: 1, 3, 256>}, {pipeline_mode = #tpu.pipeline_mode<synchronous>, transform_indices = @transform_2, window_bounds = array<i64: 32, 3>}, {pipeline_mode = #tpu.pipeline_mode<synchronous>, transform_indices = @transform_3, window_bounds = array<i64: 32, 1>}, {pipeline_mode = #tpu.pipeline_mode<synchronous>, transform_indices = @transform_4, window_bounds = array<i64: 3, 32>}, {pipeline_mode = #tpu.pipeline_mode<synchronous>, transform_indices = @transform_5, window_bounds = array<i64: 3, 1>}, {transform_indices = @transform_6, window_bounds = array<i64: 1, 3, 256>}]} {
    %c0 = arith.constant 0 : index
    %0 = memref.load %arg2[%c0] : memref<2xf32, #tpu.memory_space<smem>>
    %c1 = arith.constant 1 : index
    %1 = memref.load %arg2[%c1] : memref<2xf32, #tpu.memory_space<smem>>
    %c0_0 = arith.constant 0 : index
    %c0_1 = arith.constant 0 : index
    %c0_2 = arith.constant 0 : index
    %2 = vector.load %arg3[%c0_0, %c0_1, %c0_2] : memref<1x3x256xf32, #tpu.memory_space<vmem>>, vector<1x3x256xf32>
    %3 = vector.shape_cast %2 : vector<1x3x256xf32> to vector<3x256xf32>
    %c0_3 = arith.constant 0 : index
    %c0_4 = arith.constant 0 : index
    %4 = vector.load %arg4[%c0_3, %c0_4] : memref<32x3xf32, #tpu.memory_space<vmem>>, vector<32x3xf32>
    %cst = arith.constant dense<0.000000e+00> : vector<32x256xf32>
    %5 = tpu.matmul %4, %3, %cst {dimension_numbers = #tpu.dot_dimension_numbers<[1], [0], [0], [1], [0, 0, 1, 1], [], []>} : vector<32x3xf32>, vector<3x256xf32>, vector<32x256xf32> -> vector<32x256xf32>
    %c0_5 = arith.constant 0 : index
    %c0_6 = arith.constant 0 : index
    %6 = vector.load %arg5[%c0_5, %c0_6] : memref<32x1xf32, #tpu.memory_space<vmem>>, vector<32x1xf32>
    %7 = vector.broadcast %6 : vector<32x1xf32> to vector<32x256xf32>
    %8 = arith.addf %5, %7 : vector<32x256xf32>
    %9 = arith.truncf %8 : vector<32x256xf32> to vector<32x256xbf16>
    %cst_7 = arith.constant 5.000000e-01 : bf16
    %10 = vector.broadcast %cst_7 : bf16 to vector<32x256xbf16>
    %11 = arith.mulf %10, %9 : vector<32x256xbf16>
    %12 = arith.mulf %9, %9 : vector<32x256xbf16>
    %cst_8 = arith.constant 3.564450e-02 : bf16
    %13 = vector.broadcast %cst_8 : bf16 to vector<32x256xbf16>
    %14 = arith.mulf %13, %12 : vector<32x256xbf16>
    %cst_9 = arith.constant 7.968750e-01 : bf16
    %15 = vector.broadcast %cst_9 : bf16 to vector<32x256xbf16>
    %16 = arith.addf %15, %14 : vector<32x256xbf16>
    %17 = arith.mulf %9, %16 : vector<32x256xbf16>
    %18 = math.tanh %17 : vector<32x256xbf16>
    %19 = arith.mulf %11, %18 : vector<32x256xbf16>
    %20 = arith.addf %11, %19 : vector<32x256xbf16>
    %c0_10 = arith.constant 0 : index
    %c0_11 = arith.constant 0 : index
    %21 = vector.load %arg6[%c0_10, %c0_11] : memref<3x32xbf16, #tpu.memory_space<vmem>>, vector<3x32xbf16>
    %cst_12 = arith.constant dense<0.000000e+00> : vector<3x256xf32>
    %22 = tpu.matmul %21, %20, %cst_12 {dimension_numbers = #tpu.dot_dimension_numbers<[1], [0], [0], [1], [0, 0, 1, 1], [], []>} : vector<3x32xbf16>, vector<32x256xbf16>, vector<3x256xf32> -> vector<3x256xf32>
    %c0_13 = arith.constant 0 : index
    %c0_14 = arith.constant 0 : index
    %23 = vector.load %arg7[%c0_13, %c0_14] : memref<3x1xf32, #tpu.memory_space<vmem>>, vector<3x1xf32>
    %24 = vector.broadcast %23 : vector<3x1xf32> to vector<3x256xf32>
    %25 = arith.addf %22, %24 : vector<3x256xf32>
    %26 = vector.broadcast %0 : f32 to vector<3x256xf32>
    %27 = arith.mulf %26, %3 : vector<3x256xf32>
    %28 = vector.broadcast %1 : f32 to vector<3x256xf32>
    %29 = arith.mulf %28, %25 : vector<3x256xf32>
    %30 = arith.subf %27, %29 : vector<3x256xf32>
    %c0_15 = arith.constant 0 : index
    %c0_16 = arith.constant 0 : index
    %c0_17 = arith.constant 0 : index
    %31 = vector.load %arg8[%c0_15, %c0_16, %c0_17] : memref<1x3x256xf32, #tpu.memory_space<vmem>>, vector<1x3x256xf32>
    %32 = vector.shape_cast %31 : vector<1x3x256xf32> to vector<3x256xf32>
    %33 = vector.shape_cast %30 : vector<3x256xf32> to vector<1x3x256xf32>
    tpu.vector_store %arg8[%c0_15, %c0_16, %c0_17], %33 {strides = array<i32>} : memref<1x3x256xf32, #tpu.memory_space<vmem>>, vector<1x3x256xf32>,
    return
  }
  func.func @transform_0(%arg0: i32, %arg1: i32) -> i32 {
    %c0_i32 = arith.constant 0 : i32
    %c0_i32_0 = arith.constant 0 : i32
    return %c0_i32 : i32
  }
  func.func @transform_1(%arg0: i32, %arg1: i32) -> (i32, i32, i32) {
    %c0_i32 = arith.constant 0 : i32
    %c0_i32_0 = arith.constant 0 : i32
    return %arg0, %c0_i32, %arg1 : i32, i32, i32
  }
  func.func @transform_2(%arg0: i32, %arg1: i32) -> (i32, i32) {
    %c0_i32 = arith.constant 0 : i32
    %c0_i32_0 = arith.constant 0 : i32
    %c0_i32_1 = arith.constant 0 : i32
    return %c0_i32, %c0_i32_0 : i32, i32
  }
  func.func @transform_3(%arg0: i32, %arg1: i32) -> (i32, i32) {
    %c0_i32 = arith.constant 0 : i32
    %c0_i32_0 = arith.constant 0 : i32
    %c0_i32_1 = arith.constant 0 : i32
    return %c0_i32, %c0_i32_0 : i32, i32
  }
  func.func @transform_4(%arg0: i32, %arg1: i32) -> (i32, i32) {
    %c0_i32 = arith.constant 0 : i32
    %c0_i32_0 = arith.constant 0 : i32
    %c0_i32_1 = arith.constant 0 : i32
    return %c0_i32, %c0_i32_0 : i32, i32
  }
  func.func @transform_5(%arg0: i32, %arg1: i32) -> (i32, i32) {
    %c0_i32 = arith.constant 0 : i32
    %c0_i32_0 = arith.constant 0 : i32
    %c0_i32_1 = arith.constant 0 : i32
    return %c0_i32, %c0_i32_0 : i32, i32
  }
  func.func @transform_6(%arg0: i32, %arg1: i32) -> (i32, i32, i32) {
    %c0_i32 = arith.constant 0 : i32
    %c0_i32_0 = arith.constant 0 : i32
    return %arg0, %c0_i32, %arg1 : i32, i32, i32
  }
}

</mosaic_0001>

<bundles_post_ra>
// kernel: tpu_custom_call.1
= control target key start
LH: loop header
LB: loop body
LE: loop exit
PB: predicated region body
PF: predicated region fallthrough
CT: control target
= control target key end

     0   :  { %11 = vsyncpa [#allocation3], 0  ;;  %s893_s21 = smov 0   ;;  %s895_s22 = smov 0   ;;  %s1019_s0 = inlined_call_operand.vmem [shape: f32[2], index: 0, kind: input, shape index: {}]   ;;  %s1020_s1 = inlined_call_operand.vmem [shape: f32[2,3,256], index: 1, kind: input, shape index: {}]   ;;  %s1021_s2 = inlined_call_operand.vmem [shape: f32[32,3], index: 2, kind: input, shape index: {}]   ;;  %s1022_s3 = inlined_call_operand.vmem [shape: f32[32,1], index: 3, kind: input, shape index: {}]   ;;  %s1023_s4 = inlined_call_operand.vmem [shape: bf16[3,32], index: 4, kind: input, shape index: {}]   ;;  %s1024_s5 = inlined_call_operand.vmem [shape: f32[3,1], index: 5, kind: input, shape index: {}]   ;;  %s1025_s6 = inlined_call_operand.vmem [shape: f32[2,3,256], index: 6, kind: output, shape index: {}]  }
   0x1   :  { %s897_s23 = smov 0  }
   0x2 LB: > { %s730_s24 = sadd.s32 4294967295, %s854_s23   ;;  %s29_s25 = sadd.s32 1, %s850_s22  ;;  %s854_s23 = sphi %s897_s23, %s17_s23   ;;  %s850_s22 = sphi %s895_s22, %s1027_s22   ;;  %s846_s21 = sphi %s893_s21, %s1026_s21  }
   0x3   : > { %p31_p0 = scmp.ge.s32.totalorder %s29_s25, 2  ;;  %p732_p1 = scmp.ge.s32.totalorder %s854_s23, 1 }
   0x4   : > { %p195_p2 = scmp.lt.s32.totalorder %s854_s23, 3  ;;  %p766_p4 = scmp.eq.s32.totalorder %s730_s24, 0 }
   0x5   : > { %s1029_s25 = smov (%p31_p0, %s29_s25), 0  ;;  %s207_s28 = sshll.u32 %s1019_s0, 4  ;;  %s208_s28 = int_to_ptr.vmem [resolvable:$true] %s207_s28 }
   0x6   : > { %p196_p3 = pnand %p732_p1, %p195_p2  ;;  %s856_s29 = smov [#allocation2]  }
   0x8   : > { %p762_p5 = pneg %p196_p3  ;;  %245 = sbr.rel (%p196_p3) target bundleno = 382 (0x17e), region = 44 }
   0xa   : > { %p763_p6 = pnand %p766_p4, %p762_p5 }
   0xc   : > { %765 = dma.vmem_to_smem (!%p763_p6), %s208_s28, 16, %s856_s29, [#allocation3]  }
   0xd   : > { %841 = dma.done.wait (%p766_p4), [#allocation3], 16  }
   0xe   : > { %843 = vsyncadd (%p766_p4), [#allocation3], 4294967280 }
   0xf   : > { %252 = sfence }
  0x10   : > { %p286_p7 = scmp.lt.s32.totalorder %s846_s21, 1  ;;  %v857_v0 = vmov 0   ;;  %v313_v1 = vld [vmem:[%s1022_s3] sm:$0xff]  ;;  %v315_v2 = vld [vmem:[%s1022_s3 + $0x10] sm:$0xff]  ;;  %v314_v4 = vld [vmem:[%s1022_s3 + $0x8] sm:$0xff]  ;;  %vm354_vm0 = vcmask 1042432  }
  0x11   : > { %795 = vset.pattern.permute.xlu1 %v857_v0  ;;  %794 = vset.pattern.permute.xlu0 %v857_v0  ;;  %v316_v5 = vld [vmem:[%s1022_s3 + $0x18] sm:$0xff]  ;;  %v309_v6 = vld [vmem:[%s1021_s2] sm:$0xff]  ;;  %vm341_vm1 = vcmask 23552   ;;  %v310_v9 = vld [vmem:[%s1021_s2 + $0x8] sm:$0xff]  ;;  %vm588_vm2 = vcmask 261120   ;;  %s741_s11 = sld [smem:[#allocation2 + $0x1]] }
  0x12   : > { %s1031_s21 = smov (!%p286_p7, %s846_s21), 1  ;;  %319 = vperm.xlu1 %795, %v313_v1   ;;  %329 = vperm.xlu0 %794, %v315_v2   ;;  %v311_v10 = vld [vmem:[%s1021_s2 + $0x10] sm:$0xff]  ;;  %v312_v11 = vld [vmem:[%s1021_s2 + $0x18] sm:$0xff]  ;;  %s306_s12 = sld [smem:[#allocation2]]  ;;  %vm626_vm3 = vcmask 1043456  }
  0x13   : > { %796 = vset.pattern.permute.xlu2 %v857_v0  ;;  %s756_s10 = sshll.u32 %s1031_s21, 3 }
  0x14   : > { %s293_s13 = scalar_lea.vmem %s1020_s1, %s756_s10  ;;  %s303_s15 = scalar_lea.vmem %s1025_s6, %s756_s10 }
  0x15   : > { %v929_v3 = vld [vmem:[%s293_s13] sm:$0x77] }
  0x16   : > { %338 = vst [vmem:[#allocation1] ss:$2 sm:$0xff] %v929_v3 }
  0x1a   : > { %324 = vperm.xlu1 %795, %v314_v4   ;;  %334 = vperm.xlu0 %794, %v316_v5  }
  0x1d   : > { %v339_v7 = vld.sshfl [vmem:[#allocation1] sm:$0xff pattern:$0x75316420]  ;;  %v340_v8 = vld.sshfl [vmem:[#allocation1 + $0x8] sm:$0xff pattern:$0x75316420] }
  0x1e   : > { %742 = vmatpush.msk.msra.mxu0 %vm354_vm0, %v339_v7  ;;  %747 = vmatpush.msk.msra.mxu1 %vm354_vm0, %v340_v8 }
  0x1f   : > { %743 = vmatmul.msk.f32.vlgmr.msra.gmra.mxu0 %vm341_vm1, %v309_v6  ;;  %748 = vmatmul.msk.f32.vlgmr.msra.gmra.mxu1 %vm341_vm1, %v309_v6 }
  0x27   : > { %744 = vmatmul.msk.f32.gmra.mxu0 %vm341_vm1, %v310_v9  ;;  %749 = vmatmul.msk.f32.gmra.mxu1 %vm341_vm1, %v310_v9 }
  0x2f   : > { %745 = vmatmul.msk.f32.gmra.mxu0 %vm341_vm1, %v311_v10  ;;  %750 = vmatmul.msk.f32.gmra.mxu1 %vm341_vm1, %v311_v10 }
  0x37   : > { %746 = vmatmul.msk.f32.gmra.mxu0 %vm341_vm1, %v312_v11  ;;  %751 = vmatmul.msk.f32.gmra.mxu1 %vm341_vm1, %v312_v11 }
  0x84   : > { %v320_v12 = vpop.permute.xlu1 %319  ;;  %v330_v33 = vpop.permute.xlu0 %329 }
  0x8c   : > { %v325_v20 = vpop.permute.xlu1 %324  ;;  %v335_v56 = vpop.permute.xlu0 %334 }
  0x9c   : > { %v376_v13 = vpop.f32.mrf.mxu0  ;;  %v405_v14 = vpop.f32.mrf.mxu1 }
  0x9d   : > { %v377_v15 = vadd.f32 %v376_v13, %v320_v12  ;;  %v406_v16 = vadd.f32 %v405_v14, %v320_v12 }
  0x9f   : > { %v417_v17 = vpack.c.bf16 %v406_v16, %v377_v15 }
  0xa1   : > { %v950_v18 = vunpack.c.l.bf16 %v417_v17  ;;  %v952_v19 = vunpack.c.h.bf16 %v417_v17 }
  0xa3   : > { %v441_v21 = vmul.f32 %v950_v18, %v950_v18  ;;  %v442_v22 = vmul.f32 %v952_v19, %v952_v19 }
  0xa4   : > { %v379_v23 = vpop.f32.mrf.mxu0  ;;  %v408_v24 = vpop.f32.mrf.mxu1 }
  0xa5   : > { %v449_v25 = vpack.c.bf16 %v442_v22, %v441_v21  ;;  %v380_v26 = vadd.f32 %v379_v23, %v325_v20  ;;  %v409_v27 = vadd.f32 %v408_v24, %v325_v20 }
  0xa7   : > { %v453_v28 = vunpack.c.l.bf16 %v449_v25  ;;  %v454_v29 = vunpack.c.h.bf16 %v449_v25  ;;  %v418_v30 = vpack.c.bf16 %v409_v27, %v380_v26 }
  0xa9   : > { %v461_v31 = vmul.f32 0.03564453, %v453_v28  ;;  %v462_v32 = vmul.f32 0.03564453, %v454_v29  ;;  %v958_v34 = vunpack.c.l.bf16 %v418_v30  ;;  %v960_v35 = vunpack.c.h.bf16 %v418_v30 }
  0xab   : > { %v469_v36 = vpack.c.bf16 %v462_v32, %v461_v31  ;;  %v443_v37 = vmul.f32 %v958_v34, %v958_v34  ;;  %v444_v38 = vmul.f32 %v960_v35, %v960_v35 }
  0xac   : > { %v382_v39 = vpop.f32.mrf.mxu0  ;;  %v411_v40 = vpop.f32.mrf.mxu1 }
  0xad   : > { %v473_v41 = vunpack.c.l.bf16 %v469_v36  ;;  %v474_v42 = vunpack.c.h.bf16 %v469_v36  ;;  %v383_v43 = vadd.f32 %v382_v39, %v330_v33  ;;  %v412_v44 = vadd.f32 %v411_v40, %v330_v33 }
  0xae   : > { %v450_v45 = vpack.c.bf16 %v444_v38, %v443_v37 }
  0xaf   : > { %v481_v46 = vadd.f32 0.796875, %v473_v41  ;;  %v482_v47 = vadd.f32 0.796875, %v474_v42  ;;  %v419_v48 = vpack.c.bf16 %v412_v44, %v383_v43 }
  0xb0   : > { %v455_v49 = vunpack.c.l.bf16 %v450_v45  ;;  %v456_v50 = vunpack.c.h.bf16 %v450_v45 }
  0xb1   : > { %v489_v51 = vpack.c.bf16 %v482_v47, %v481_v46  ;;  %v966_v52 = vunpack.c.l.bf16 %v419_v48  ;;  %v968_v53 = vunpack.c.h.bf16 %v419_v48 }
  0xb2   : > { %v463_v54 = vmul.f32 0.03564453, %v455_v49  ;;  %v464_v55 = vmul.f32 0.03564453, %v456_v50 }
  0xb3   : > { %v445_v57 = vmul.f32 %v966_v52, %v966_v52  ;;  %v446_v58 = vmul.f32 %v968_v53, %v968_v53  ;;  %v493_v62 = vunpack.c.l.bf16 %v489_v51  ;;  %v494_v1 = vunpack.c.h.bf16 %v489_v51 }
  0xb4   : > { %v470_v59 = vpack.c.bf16 %v464_v55, %v463_v54  ;;  %v385_v60 = vpop.f32.mrf.mxu0  ;;  %v414_v61 = vpop.f32.mrf.mxu1 }
  0xb5   : > { %v451_v63 = vpack.c.bf16 %v446_v58, %v445_v57  ;;  %v386_v0 = vadd.f32 %v385_v60, %v335_v56  ;;  %v415_v5 = vadd.f32 %v414_v61, %v335_v56  ;;  %v501_v11 = vmul.f32 %v493_v62, %v950_v18 }
  0xb6   : > { %v475_v2 = vunpack.c.l.bf16 %v470_v59  ;;  %v476_v4 = vunpack.c.h.bf16 %v470_v59  ;;  %v502_v14 = vmul.f32 %v494_v1, %v952_v19 }
  0xb7   : > { %v457_v6 = vunpack.c.l.bf16 %v451_v63  ;;  %v458_v7 = vunpack.c.h.bf16 %v451_v63  ;;  %v420_v10 = vpack.c.bf16 %v415_v5, %v386_v0 }
  0xb8   : > { %v483_v8 = vadd.f32 0.796875, %v475_v2  ;;  %v484_v9 = vadd.f32 0.796875, %v476_v4  ;;  %v509_v27 = vpack.c.bf16 %v502_v14, %v501_v11 }
  0xb9   : > { %v465_v12 = vmul.f32 0.03564453, %v457_v6  ;;  %v466_v13 = vmul.f32 0.03564453, %v458_v7  ;;  %v976_v16 = vunpack.c.l.bf16 %v420_v10  ;;  %v978_v17 = vunpack.c.h.bf16 %v420_v10  ;;  %v582_v10 = vld [vmem:[%s1024_s5] sm:$0x7] }
  0xba   : > { %v490_v15 = vpack.c.bf16 %v484_v9, %v483_v8  ;;  %v513_v39 = vunpack.c.l.bf16 %v509_v27  ;;  %v514_v54 = vunpack.c.h.bf16 %v509_v27  ;;  %v433_v6 = vmul.f32 0.5, %v966_v52  ;;  %585 = vperm.xlu2 %796, %v582_v10  }
  0xbb   : > { %v471_v20 = vpack.c.bf16 %v466_v13, %v465_v12  ;;  %v447_v23 = vmul.f32 %v976_v16, %v976_v16  ;;  %v448_v26 = vmul.f32 %v978_v17, %v978_v17  ;;  %v434_v7 = vmul.f32 0.5, %v968_v53 }
  0xbc   : > { %v495_v21 = vunpack.c.l.bf16 %v490_v15  ;;  %v496_v22 = vunpack.c.h.bf16 %v490_v15  ;;  %797 = vtanh.f32 %v513_v39  ;;  %v431_v9 = vmul.f32 0.5, %v958_v34 }
  0xbd   : > { %v477_v24 = vunpack.c.l.bf16 %v471_v20  ;;  %v478_v25 = vunpack.c.h.bf16 %v471_v20  ;;  %v452_v32 = vpack.c.bf16 %v448_v26, %v447_v23  ;;  %v432_v12 = vmul.f32 0.5, %v960_v35 }
  0xbe   : > { %v503_v28 = vmul.f32 %v495_v21, %v958_v34  ;;  %v504_v29 = vmul.f32 %v496_v22, %v960_v35  ;;  %v429_v20 = vmul.f32 0.5, %v950_v18  ;;  %v435_v34 = vmul.f32 0.5, %v976_v16 }
  0xbf   : > { %v485_v30 = vadd.f32 0.796875, %v477_v24  ;;  %v486_v31 = vadd.f32 0.796875, %v478_v25  ;;  %v459_v37 = vunpack.c.l.bf16 %v452_v32  ;;  %v460_v38 = vunpack.c.h.bf16 %v452_v32 }
  0xc0   : > { %v510_v33 = vpack.c.bf16 %v504_v29, %v503_v28  ;;  %v436_v22 = vmul.f32 0.5, %v978_v17  ;;  %v438_v35 = vpack.c.bf16 %v432_v12, %v431_v9 }
  0xc1   : > { %v491_v36 = vpack.c.bf16 %v486_v31, %v485_v30  ;;  %v467_v42 = vmul.f32 0.03564453, %v459_v37  ;;  %v468_v43 = vmul.f32 0.03564453, %v460_v38 }
  0xc2   : > { %v515_v44 = vunpack.c.l.bf16 %v510_v33  ;;  %v516_v48 = vunpack.c.h.bf16 %v510_v33  ;;  %v798_v60 = vpop.eup %797  ;;  %v440_v18 = vpack.c.bf16 %v436_v22, %v435_v34  ;;  %v535_v37 = vunpack.c.l.bf16 %v438_v35 }
  0xc3   : > { %v497_v40 = vunpack.c.l.bf16 %v491_v36  ;;  %v498_v41 = vunpack.c.h.bf16 %v491_v36  ;;  %v472_v47 = vpack.c.bf16 %v468_v43, %v467_v42  ;;  %v536_v38 = vunpack.c.h.bf16 %v438_v35 }
  0xc4   : > { %799 = vtanh.f32 %v515_v44  ;;  %v539_v43 = vunpack.c.l.bf16 %v440_v18  ;;  %v618_v22 = vstv %s306_s12 }
  0xc5   : > { %v505_v45 = vmul.f32 %v497_v40, %v966_v52  ;;  %v506_v46 = vmul.f32 %v498_v41, %v968_v53  ;;  %v479_v50 = vunpack.c.l.bf16 %v472_v47  ;;  %v480_v51 = vunpack.c.h.bf16 %v472_v47 }
  0xc6   : > { %801 = vtanh.f32 %v516_v48  ;;  %v430_v52 = vmul.f32 0.5, %v952_v19  ;;  %v439_v53 = vpack.c.bf16 %v434_v7, %v433_v6 }
  0xc7   : > { %v511_v49 = vpack.c.bf16 %v506_v46, %v505_v45  ;;  %v487_v57 = vadd.f32 0.796875, %v479_v50  ;;  %v488_v58 = vadd.f32 0.796875, %v480_v51  ;;  %v540_v46 = vunpack.c.h.bf16 %v440_v18 }
  0xc8   : > { %v437_v26 = vpack.c.bf16 %v430_v52, %v429_v20  ;;  %v537_v27 = vunpack.c.l.bf16 %v439_v53  ;;  %v538_v28 = vunpack.c.h.bf16 %v439_v53  ;;  %v620_v52 = vstv %s741_s11 }
  0xc9   : > { %v517_v55 = vunpack.c.l.bf16 %v511_v49  ;;  %v518_v56 = vunpack.c.h.bf16 %v511_v49  ;;  %v492_v59 = vpack.c.bf16 %v488_v58, %v487_v57 }
  0xca   : > { %v800_v63 = vpop.eup %799  ;;  %v533_v39 = vunpack.c.l.bf16 %v437_v26 }
  0xcb   : > { %803 = vtanh.f32 %v517_v55  ;;  %v499_v61 = vunpack.c.l.bf16 %v492_v59  ;;  %v500_v62 = vunpack.c.h.bf16 %v492_v59 }
  0xcc   : > { %805 = vtanh.f32 %v518_v56  ;;  %v802_v2 = vpop.eup %801 }
  0xcd   : > { %807 = vtanh.f32 %v514_v54  ;;  %v507_v0 = vmul.f32 %v499_v61, %v976_v16  ;;  %v508_v1 = vmul.f32 %v500_v62, %v978_v17  ;;  %v530_v21 = vpack.c.bf16 %v802_v2, %v800_v63 }
  0xce   : > { %v534_v17 = vunpack.c.h.bf16 %v437_v26 }
  0xcf   : > { %v512_v5 = vpack.c.bf16 %v508_v1, %v507_v0  ;;  %v543_v29 = vunpack.c.l.bf16 %v530_v21  ;;  %v544_v30 = vunpack.c.h.bf16 %v530_v21 }
  0xd1   : > { %v804_v4 = vpop.eup %803  ;;  %v519_v13 = vunpack.c.l.bf16 %v512_v5  ;;  %v520_v14 = vunpack.c.h.bf16 %v512_v5  ;;  %v551_v41 = vmul.f32 %v543_v29, %v535_v37  ;;  %v552_v42 = vmul.f32 %v544_v30, %v536_v38 }
  0xd2   : > { %v806_v8 = vpop.eup %805 }
  0xd3   : > { %v808_v11 = vpop.eup %807  ;;  %v531_v15 = vpack.c.bf16 %v806_v8, %v804_v4  ;;  %809 = vtanh.f32 %v519_v13  ;;  %v558_v54 = vpack.c.bf16 %v552_v42, %v551_v41 }
  0xd4   : > { %811 = vtanh.f32 %v520_v14  ;;  %v529_v23 = vpack.c.bf16 %v808_v11, %v798_v60  ;;  %v581_v14 = vld [vmem:[%s1023_s4] sm:$0x3] }
  0xd5   : > { %v545_v24 = vunpack.c.l.bf16 %v531_v15  ;;  %v546_v25 = vunpack.c.h.bf16 %v531_v15  ;;  %v563_v61 = vunpack.c.l.bf16 %v558_v54  ;;  %v564_v62 = vunpack.c.h.bf16 %v558_v54 }
  0xd6   : > { %v541_v31 = vunpack.c.l.bf16 %v529_v23  ;;  %v542_v19 = vunpack.c.h.bf16 %v529_v23 }
  0xd7   : > { %v553_v33 = vmul.f32 %v545_v24, %v537_v27  ;;  %v554_v36 = vmul.f32 %v546_v25, %v538_v28  ;;  %v571_v8 = vadd.f32 %v563_v61, %v535_v37  ;;  %v572_v9 = vadd.f32 %v564_v62, %v536_v38 }
  0xd8   : > { %v549_v44 = vmul.f32 %v541_v31, %v533_v39  ;;  %v550_v45 = vmul.f32 %v542_v19, %v534_v17  ;;  %v619_v24 = vmul.f32 %v618_v22, %v929_v3 }
  0xd9   : > { %v810_v32 = vpop.eup %809  ;;  %v559_v49 = vpack.c.bf16 %v554_v36, %v553_v33 }
  0xda   : > { %v812_v16 = vpop.eup %811  ;;  %v557_v55 = vpack.c.bf16 %v550_v45, %v549_v44 }
  0xdb   : > { %v532_v40 = vpack.c.bf16 %v812_v16, %v810_v32  ;;  %v565_v57 = vunpack.c.l.bf16 %v559_v49  ;;  %v566_v58 = vunpack.c.h.bf16 %v559_v49 }
  0xdc   : > { %v561_v63 = vunpack.c.l.bf16 %v557_v55  ;;  %v562_v0 = vunpack.c.h.bf16 %v557_v55 }
  0xdd   : > { %v547_v47 = vunpack.c.l.bf16 %v532_v40  ;;  %v548_v48 = vunpack.c.h.bf16 %v532_v40  ;;  %v573_v1 = vadd.f32 %v565_v57, %v537_v27  ;;  %v574_v4 = vadd.f32 %v566_v58, %v538_v28 }
  0xde   : > { %v569_v10 = vadd.f32 %v561_v63, %v533_v39  ;;  %v570_v11 = vadd.f32 %v562_v0, %v534_v17 }
  0xdf   : > { %v555_v50 = vmul.f32 %v547_v47, %v539_v43  ;;  %v556_v51 = vmul.f32 %v548_v48, %v540_v46 }
  0xe0   : > { %v577_v12 = vpack.c.bf16 %v571_v8, %v569_v10  ;;  %v578_v13 = vpack.c.bf16 %v572_v9, %v570_v11 }
  0xe1   : > { %v560_v56 = vpack.c.bf16 %v556_v51, %v555_v50 }
  0xe3   : > { %v567_v59 = vunpack.c.l.bf16 %v560_v56  ;;  %v568_v60 = vunpack.c.h.bf16 %v560_v56 }
  0xe5   : > { %v575_v2 = vadd.f32 %v567_v59, %v539_v43  ;;  %v576_v5 = vadd.f32 %v568_v60, %v540_v46 }
  0xe7   : > { %v579_v6 = vpack.c.bf16 %v575_v2, %v573_v1  ;;  %v580_v7 = vpack.c.bf16 %v576_v5, %v574_v4 }
  0xe9   : > { %598 = vmatpush.bf16.msra.mxu2 %v579_v6  ;;  %611 = vmatpush.bf16.msra.mxu3 %v580_v7 }
  0xed   : > { %599 = vmatpush.bf16.msra.mxu2 %v577_v12  ;;  %612 = vmatpush.bf16.msra.mxu3 %v578_v13 }
  0xf0   : > { %752 = vmatmul.msk.bf16.vlgmr.msra.gmra.mxu2 %vm588_vm2, %v581_v14  ;;  %753 = vmatmul.msk.bf16.vlgmr.msra.gmra.mxu3 %vm588_vm2, %v581_v14 }
 0x114   : > { %v586_v15 = vpop.permute.xlu2 %585 }
 0x173   : > { %v601_v20 = vpop.f32.mrf.mxu2  ;;  %v614_v53 = vpop.f32.mrf.mxu3 }
 0x174   : > { %v602_v21 = vadd.f32 %v601_v20, %v586_v15  ;;  %v615_v34 = vadd.f32 %v614_v53, %v586_v15 }
 0x176   : > { %v622_v23 = vmul.f32 %v620_v52, %v615_v34  ;;  %v621_v25 = vmul.f32 %v620_v52, %v602_v21 }
 0x178   : > { %v625_v35 = vrot.slane %v622_v23, 4 }
 0x17a   : > { %v627_v26 = vsel %vm626_vm3, %v621_v25, %v625_v35 }
 0x17b   : > { %v629_v27 = vsub.f32 %v619_v24, %v627_v26  ;;  %v603_v28 = vpop.f32.mrf.mxu2  ;;  %v616_v29 = vpop.f32.mrf.mxu3 }
 0x17d   : > { %630 = vst [vmem:[%s303_s15] sm:$0x77] %v629_v27 }
 0x17e PF: > { %s17_s23 = sadd.s32 1, %s854_s23   ;;  %s1026_s21 = smov %s850_s22 }
 0x17f   : > { %p14_p8 = scmp.ge.s32.totalorder %s17_s23, 4   ;;  %s1027_s22 = smov %s1029_s25 }
 0x181   :  { %16 = sbr.rel (!%p14_p8) target bundleno = 2 (0x2), region = 79 }
 0x186   :  { %661 = vsyncpa [#allocation3], 1 }
 0x187   :  { %663 = vsyncpa [#allocation3 + $0x1], 1 }

</bundles_post_ra>
